<compile_context>
chip_gen: v7x
topology: tpu7x:2x2x1
jax: 0.10.0
libtpu: 0.0.40
codegen_flags: <defaults>
</compile_context>

<pallas_src>
import jax
import jax.numpy as jnp
from jax.experimental import pallas as pl
from jax.experimental.pallas import tpu as pltpu


def _round_up(n, m):
    return ((n + m - 1) // m) * m


def bottleneck_kernel(x_ref, w1_ref, b1_ref, w2_ref, b2_ref, w3_ref, b3_ref, o_ref):
    bb, L, cin_p = x_ref.shape
    R = bb * L
    x = x_ref[...].reshape(R, cin_p)                      # (R, Cpad) f32, kept for residual

    # ---- conv1 (1x1, BN1 scale folded into w1) + shift + relu ----
    h = jnp.dot(x.astype(jnp.bfloat16), w1_ref[...],
                preferred_element_type=jnp.float32)       # (R, Ppad)
    h = jnp.maximum(h + b1_ref[...], 0.0)

    # ---- conv2 (k=3, pad=1, stride=1, BN2 folded): single fused matmul over the 3 taps ----
    P = h.shape[1]
    zero_row = jnp.zeros((1, P), jnp.float32)
    h_prev = jnp.concatenate([zero_row, h[:-1, :]], axis=0)   # h_prev[r] = h[r-1], 0 at r=0
    h_next = jnp.concatenate([h[1:, :], zero_row], axis=0)    # h_next[r] = h[r+1], 0 at r=R-1
    if bb > 1:
        # multiple samples are flattened into the row axis: zero the cross-sample taps
        row = jax.lax.broadcasted_iota(jnp.int32, (R, P), 0)
        h_prev = jnp.where((row % L) != 0, h_prev, 0.0)
        h_next = jnp.where((row % L) != L - 1, h_next, 0.0)
    h3 = jnp.concatenate([h_prev, h, h_next], axis=-1).astype(jnp.bfloat16)   # (R, 3*Ppad)
    g = jnp.dot(h3, w2_ref[...], preferred_element_type=jnp.float32)          # (R, Ppad)
    g = jnp.maximum(g + b2_ref[...], 0.0)

    # ---- conv3 (1x1, BN3 folded) + shift ----
    y = jnp.dot(g.astype(jnp.bfloat16), w3_ref[...],
                preferred_element_type=jnp.float32)       # (R, Coutpad)
    y = y + b3_ref[...]

    # ---- residual add (downsample=None -> identity) + relu ----
    o_ref[...] = jnp.maximum(y + x, 0.0).reshape(bb, L, -1)


def fold_bn(gamma, beta, mean, var, eps=1e-5):
    scale = gamma / jnp.sqrt(var + eps)
    shift = beta - mean * scale
    return scale, shift


def prepare_params(tp):
    """Fold BN scales into the conv weights, transpose to (in, out), pad channels to 128 lanes,
    cast weights to bf16. Shifts stay f32."""
    conv1_w, conv2_w, conv3_w = tp["conv1_w"], tp["conv2_w"], tp["conv3_w"]
    planes, inplanes, _ = conv1_w.shape
    cout = conv3_w.shape[0]

    s1, b1 = fold_bn(*tp["bn1"])
    s2, b2 = fold_bn(*tp["bn2"])
    s3, b3 = fold_bn(*tp["bn3"])

    cin_p = _round_up(inplanes, 128)
    p_p = _round_up(planes, 128)
    cout_p = _round_up(cout, 128)

    w1 = conv1_w[:, :, 0].T * s1[None, :]                 # (Cin, P)
    w3 = conv3_w[:, :, 0].T * s3[None, :]                 # (P, Cout)

    w1p = jnp.zeros((cin_p, p_p), jnp.float32).at[:inplanes, :planes].set(w1)
    w3p = jnp.zeros((p_p, cout_p), jnp.float32).at[:planes, :cout].set(w3)

    w2p = jnp.zeros((3 * p_p, p_p), jnp.float32)          # rows: [prev tap; center tap; next tap]
    for t in range(3):
        tap = conv2_w[:, :, t].T * s2[None, :]            # (P, P)
        w2p = w2p.at[t * p_p:t * p_p + planes, :planes].set(tap)

    b1p = jnp.zeros((1, p_p), jnp.float32).at[0, :planes].set(b1)
    b2p = jnp.zeros((1, p_p), jnp.float32).at[0, :planes].set(b2)
    b3p = jnp.zeros((1, cout_p), jnp.float32).at[0, :cout].set(b3)

    return dict(
        w1=w1p.astype(jnp.bfloat16), b1=b1p,
        w2=w2p.astype(jnp.bfloat16), b2=b2p,
        w3=w3p.astype(jnp.bfloat16), b3=b3p,
        cin=inplanes, cin_p=cin_p, p_p=p_p, cout=cout, cout_p=cout_p,
    )


def bottleneck_pallas(x_nlc, pp, *, block_b=None):
    """x_nlc: (B, L, Cin) float32 channels-last. Returns (B, L, Cout) float32 (Cout == Cin)."""
    B, L, cin = x_nlc.shape
    assert cin == pp["cin"] and pp["cout"] == cin, \
        "downsample=None requires inplanes == planes * expansion"
    assert L % 8 == 0, "sequence length must be a multiple of 8 (sublane tiling)"

    cin_p, cout_p = pp["cin_p"], pp["cout_p"]
    assert cin_p == cout_p

    if block_b is None:                                   # target a few hundred rows per step
        block_b = max(1, min(B, 512 // L))
    while B % block_b:
        block_b -= 1

    xp = jnp.pad(x_nlc.astype(jnp.float32), ((0, 0), (0, 0), (0, cin_p - cin)))

    const2d = lambda a: pl.BlockSpec(a.shape, lambda i: (0, 0))   # whole-array constants
    out = pl.pallas_call(
        bottleneck_kernel,
        out_shape=jax.ShapeDtypeStruct((B, L, cout_p), jnp.float32),
        grid_spec=pltpu.PrefetchScalarGridSpec(
            num_scalar_prefetch=0,
            grid=(B // block_b,),
            in_specs=[
                pl.BlockSpec((block_b, L, cin_p), lambda i: (i, 0, 0)),   # x
                const2d(pp["w1"]), const2d(pp["b1"]),                     # conv1 (+bn1 shift)
                const2d(pp["w2"]), const2d(pp["b2"]),                     # conv2 fused taps
                const2d(pp["w3"]), const2d(pp["b3"]),                     # conv3 (+bn3 shift)
            ],
            out_specs=pl.BlockSpec((block_b, L, cout_p), lambda i: (i, 0, 0)),
        ),
        compiler_params=pltpu.CompilerParams(dimension_semantics=("parallel",)),
    )(xp, pp["w1"], pp["b1"], pp["w2"], pp["b2"], pp["w3"], pp["b3"])
    return out[:, :, :pp["cout"]]


def make_torch_params(key, inplanes, planes):
    """Deterministic PyTorch-layout weights/BN stats (distinct keys for every tensor)."""
    expansion = 4
    cout = planes * expansion
    k = jax.random.split(key, 6)
    normal = jax.random.normal

    def bn_params(kk, c):
        kg, kb, km, kv = jax.random.split(kk, 4)
        gamma = 1.0 + 0.1 * normal(kg, (c,), jnp.float32)
        beta = 0.1 * normal(kb, (c,), jnp.float32)
        mean = 0.1 * normal(km, (c,), jnp.float32)
        var = jnp.abs(normal(kv, (c,), jnp.float32)) + 0.5
        return (gamma, beta, mean, var)

    return dict(
        conv1_w=0.1 * normal(k[0], (planes, inplanes, 1), jnp.float32),
        conv2_w=0.1 * normal(k[1], (planes, planes, 3), jnp.float32),
        conv3_w=0.1 * normal(k[2], (cout, planes, 1), jnp.float32),
        bn1=bn_params(k[3], planes),
        bn2=bn_params(k[4], planes),
        bn3=bn_params(k[5], cout),
    )


def reference_forward(x_nlc, tp):
    """Pure-JAX f32 reference matching PyTorch Bottleneck.forward (eval-mode BN)."""
    s1, b1 = fold_bn(*tp["bn1"])
    s2, b2 = fold_bn(*tp["bn2"])
    s3, b3 = fold_bn(*tp["bn3"])
    w1 = tp["conv1_w"][:, :, 0]
    w2 = tp["conv2_w"]
    w3 = tp["conv3_w"][:, :, 0]

    h = jnp.maximum(x_nlc @ w1.T * s1 + b1, 0.0)
    hp = jnp.pad(h, ((0, 0), (1, 1), (0, 0)))
    g = hp[:, :-2] @ w2[:, :, 0].T + hp[:, 1:-1] @ w2[:, :, 1].T + hp[:, 2:] @ w2[:, :, 2].T
    g = jnp.maximum(g * s2 + b2, 0.0)
    y = g @ w3.T * s3 + b3
    return jnp.maximum(y + x_nlc, 0.0)


if __name__ == "__main__":
    key = jax.random.PRNGKey(0)
    kx, kp = jax.random.split(key)

    inplanes, planes, L, B = 32, 8, 16, 2     # inplanes == planes * expansion(=4)
    tp = make_torch_params(kp, inplanes, planes)
    pp = prepare_params(tp)

    # PyTorch-style input is (N, C, L); go channels-last for the kernel.
    x_ncl = jax.random.normal(kx, (B, inplanes, L), jnp.float32)
    x_nlc = jnp.transpose(x_ncl, (0, 2, 1))

    out_nlc = jax.block_until_ready(bottleneck_pallas(x_nlc, pp))
    out_ncl = jnp.transpose(out_nlc, (0, 2, 1))   # back to PyTorch (N, C, L)

    ref = reference_forward(x_nlc, tp)
    assert out_ncl.shape == (B, inplanes, L)
    # bf16 MXU inputs with f32 accumulation -> allow a small tolerance vs the f32 reference
    assert jnp.allclose(out_nlc, ref, atol=3e-2, rtol=3e-2), "mismatch vs reference"

    print("KERNEL_OK")
</pallas_src>

<mosaic_0001>
module attributes {stable_mosaic.version = 11 : i64} {
  func.func @bottleneck_kernel(%arg0: i32, %arg1: memref<2x16x128xf32, #tpu.memory_space<vmem>>, %arg2: memref<128x128xbf16, #tpu.memory_space<vmem>>, %arg3: memref<1x128xf32, #tpu.memory_space<vmem>>, %arg4: memref<384x128xbf16, #tpu.memory_space<vmem>>, %arg5: memref<1x128xf32, #tpu.memory_space<vmem>>, %arg6: memref<128x128xbf16, #tpu.memory_space<vmem>>, %arg7: memref<1x128xf32, #tpu.memory_space<vmem>>, %arg8: memref<2x16x128xf32, #tpu.memory_space<vmem>>) attributes {dimension_semantics = [#tpu.dimension_semantics<parallel>], iteration_bounds = array<i64: 1>, scalar_prefetch = 0 : i64, scratch_operands = 0 : i64, tpu.core_type = #tpu.core_type<tc>, window_params = [{transform_indices = @transform_0, window_bounds = array<i64: 2, 16, 128>}, {pipeline_mode = #tpu.pipeline_mode<synchronous>, transform_indices = @transform_1, window_bounds = array<i64: 128, 128>}, {pipeline_mode = #tpu.pipeline_mode<synchronous>, transform_indices = @transform_2, window_bounds = array<i64: 1, 128>}, {pipeline_mode = #tpu.pipeline_mode<synchronous>, transform_indices = @transform_3, window_bounds = array<i64: 384, 128>}, {pipeline_mode = #tpu.pipeline_mode<synchronous>, transform_indices = @transform_4, window_bounds = array<i64: 1, 128>}, {pipeline_mode = #tpu.pipeline_mode<synchronous>, transform_indices = @transform_5, window_bounds = array<i64: 128, 128>}, {pipeline_mode = #tpu.pipeline_mode<synchronous>, transform_indices = @transform_6, window_bounds = array<i64: 1, 128>}, {transform_indices = @transform_7, window_bounds = array<i64: 2, 16, 128>}]} {
    %c0 = arith.constant 0 : index
    %c0_0 = arith.constant 0 : index
    %c0_1 = arith.constant 0 : index
    %0 = vector.load %arg1[%c0, %c0_0, %c0_1] : memref<2x16x128xf32, #tpu.memory_space<vmem>>, vector<2x16x128xf32>
    %1 = vector.shape_cast %0 : vector<2x16x128xf32> to vector<32x128xf32>
    %2 = arith.truncf %1 : vector<32x128xf32> to vector<32x128xbf16>
    %c0_2 = arith.constant 0 : index
    %c0_3 = arith.constant 0 : index
    %3 = vector.load %arg2[%c0_2, %c0_3] : memref<128x128xbf16, #tpu.memory_space<vmem>>, vector<128x128xbf16>
    %cst = arith.constant dense<0.000000e+00> : vector<32x128xf32>
    %4 = tpu.matmul %2, %3, %cst {dimension_numbers = #tpu.dot_dimension_numbers<[1], [0], [0], [1], [0, 0, 1, 1], [], []>} : vector<32x128xbf16>, vector<128x128xbf16>, vector<32x128xf32> -> vector<32x128xf32>
    %c0_4 = arith.constant 0 : index
    %c0_5 = arith.constant 0 : index
    %5 = vector.load %arg3[%c0_4, %c0_5] : memref<1x128xf32, #tpu.memory_space<vmem>>, vector<1x128xf32>
    %6 = vector.broadcast %5 : vector<1x128xf32> to vector<32x128xf32>
    %7 = arith.addf %4, %6 : vector<32x128xf32>
    %cst_6 = arith.constant 0.000000e+00 : f32
    %8 = vector.broadcast %cst_6 : f32 to vector<32x128xf32>
    %9 = arith.maximumf %7, %8 : vector<32x128xf32>
    %cst_7 = arith.constant 0.000000e+00 : f32
    %10 = vector.broadcast %cst_7 : f32 to vector<1x128xf32>
    %11 = vector.extract_strided_slice %9 {offsets = [0, 0], sizes = [31, 128], strides = [1, 1]} : vector<32x128xf32> to vector<31x128xf32>
    %12 = tpu.concatenate %10, %11 in 0 : vector<1x128xf32>, vector<31x128xf32> -> vector<32x128xf32>
    %13 = vector.extract_strided_slice %9 {offsets = [1, 0], sizes = [31, 128], strides = [1, 1]} : vector<32x128xf32> to vector<31x128xf32>
    %14 = tpu.concatenate %13, %10 in 0 : vector<31x128xf32>, vector<1x128xf32> -> vector<32x128xf32>
    %15 = tpu.iota {dimensions = array<i32: 0>} : vector<32x128xi32>
    %c16_i32 = arith.constant 16 : i32
    %c0_i32 = arith.constant 0 : i32
    %16 = arith.cmpi eq, %c16_i32, %c0_i32 : i32
    %c1_i32 = arith.constant 1 : i32
    %17 = arith.select %16, %c1_i32, %c16_i32 : i32
    %18 = vector.broadcast %17 : i32 to vector<32x128xi32>
    %19 = arith.remsi %15, %18 : vector<32x128xi32>
    %c0_i32_8 = arith.constant 0 : i32
    %20 = vector.broadcast %c0_i32_8 : i32 to vector<32x128xi32>
    %21 = arith.cmpi ne, %19, %20 : vector<32x128xi32>
    %c0_i32_9 = arith.constant 0 : i32
    %22 = vector.broadcast %c0_i32_9 : i32 to vector<32x128xi32>
    %23 = arith.cmpi slt, %19, %22 : vector<32x128xi32>
    %c0_i32_10 = arith.constant 0 : i32
    %24 = arith.cmpi slt, %17, %c0_i32_10 : i32
    %25 = vector.broadcast %24 : i1 to vector<32x128xi1>
    %26 = vector.broadcast %25 : vector<32x128xi1> to vector<32x128xi1>
    %27 = arith.xori %23, %26 : vector<32x128xi1>
    %28 = arith.andi %27, %21 : vector<32x128xi1>
    %29 = vector.broadcast %17 : i32 to vector<32x128xi32>
    %30 = arith.addi %19, %29 : vector<32x128xi32>
    %31 = arith.select %28, %30, %19 : vector<32x128xi1>, vector<32x128xi32>
    %c0_i32_11 = arith.constant 0 : i32
    %32 = vector.broadcast %c0_i32_11 : i32 to vector<32x128xi32>
    %33 = arith.cmpi ne, %31, %32 : vector<32x128xi32>
    %cst_12 = arith.constant 0.000000e+00 : f32
    %34 = vector.broadcast %cst_12 : f32 to vector<32x128xf32>
    %35 = arith.select %33, %12, %34 : vector<32x128xi1>, vector<32x128xf32>
    %c16_i32_13 = arith.constant 16 : i32
    %c0_i32_14 = arith.constant 0 : i32
    %36 = arith.cmpi eq, %c16_i32_13, %c0_i32_14 : i32
    %c1_i32_15 = arith.constant 1 : i32
    %37 = arith.select %36, %c1_i32_15, %c16_i32_13 : i32
    %38 = vector.broadcast %37 : i32 to vector<32x128xi32>
    %39 = arith.remsi %15, %38 : vector<32x128xi32>
    %c0_i32_16 = arith.constant 0 : i32
    %40 = vector.broadcast %c0_i32_16 : i32 to vector<32x128xi32>
    %41 = arith.cmpi ne, %39, %40 : vector<32x128xi32>
    %c0_i32_17 = arith.constant 0 : i32
    %42 = vector.broadcast %c0_i32_17 : i32 to vector<32x128xi32>
    %43 = arith.cmpi slt, %39, %42 : vector<32x128xi32>
    %c0_i32_18 = arith.constant 0 : i32
    %44 = arith.cmpi slt, %37, %c0_i32_18 : i32
    %45 = vector.broadcast %44 : i1 to vector<32x128xi1>
    %46 = vector.broadcast %45 : vector<32x128xi1> to vector<32x128xi1>
    %47 = arith.xori %43, %46 : vector<32x128xi1>
    %48 = arith.andi %47, %41 : vector<32x128xi1>
    %49 = vector.broadcast %37 : i32 to vector<32x128xi32>
    %50 = arith.addi %39, %49 : vector<32x128xi32>
    %51 = arith.select %48, %50, %39 : vector<32x128xi1>, vector<32x128xi32>
    %c15_i32 = arith.constant 15 : i32
    %52 = vector.broadcast %c15_i32 : i32 to vector<32x128xi32>
    %53 = arith.cmpi ne, %51, %52 : vector<32x128xi32>
    %cst_19 = arith.constant 0.000000e+00 : f32
    %54 = vector.broadcast %cst_19 : f32 to vector<32x128xf32>
    %55 = arith.select %53, %14, %54 : vector<32x128xi1>, vector<32x128xf32>
    %56 = tpu.concatenate %35, %9, %55 in 1 : vector<32x128xf32>, vector<32x128xf32>, vector<32x128xf32> -> vector<32x384xf32>
    %57 = arith.truncf %56 : vector<32x384xf32> to vector<32x384xbf16>
    %c0_20 = arith.constant 0 : index
    %c0_21 = arith.constant 0 : index
    %58 = vector.load %arg4[%c0_20, %c0_21] : memref<384x128xbf16, #tpu.memory_space<vmem>>, vector<384x128xbf16>
    %cst_22 = arith.constant dense<0.000000e+00> : vector<32x128xf32>
    %59 = tpu.matmul %57, %58, %cst_22 {dimension_numbers = #tpu.dot_dimension_numbers<[1], [0], [0], [1], [0, 0, 1, 1], [], []>} : vector<32x384xbf16>, vector<384x128xbf16>, vector<32x128xf32> -> vector<32x128xf32>
    %c0_23 = arith.constant 0 : index
    %c0_24 = arith.constant 0 : index
    %60 = vector.load %arg5[%c0_23, %c0_24] : memref<1x128xf32, #tpu.memory_space<vmem>>, vector<1x128xf32>
    %61 = vector.broadcast %60 : vector<1x128xf32> to vector<32x128xf32>
    %62 = arith.addf %59, %61 : vector<32x128xf32>
    %cst_25 = arith.constant 0.000000e+00 : f32
    %63 = vector.broadcast %cst_25 : f32 to vector<32x128xf32>
    %64 = arith.maximumf %62, %63 : vector<32x128xf32>
    %65 = arith.truncf %64 : vector<32x128xf32> to vector<32x128xbf16>
    %c0_26 = arith.constant 0 : index
    %c0_27 = arith.constant 0 : index
    %66 = vector.load %arg6[%c0_26, %c0_27] : memref<128x128xbf16, #tpu.memory_space<vmem>>, vector<128x128xbf16>
    %cst_28 = arith.constant dense<0.000000e+00> : vector<32x128xf32>
    %67 = tpu.matmul %65, %66, %cst_28 {dimension_numbers = #tpu.dot_dimension_numbers<[1], [0], [0], [1], [0, 0, 1, 1], [], []>} : vector<32x128xbf16>, vector<128x128xbf16>, vector<32x128xf32> -> vector<32x128xf32>
    %c0_29 = arith.constant 0 : index
    %c0_30 = arith.constant 0 : index
    %68 = vector.load %arg7[%c0_29, %c0_30] : memref<1x128xf32, #tpu.memory_space<vmem>>, vector<1x128xf32>
    %69 = vector.broadcast %68 : vector<1x128xf32> to vector<32x128xf32>
    %70 = arith.addf %67, %69 : vector<32x128xf32>
    %71 = arith.addf %70, %1 : vector<32x128xf32>
    %cst_31 = arith.constant 0.000000e+00 : f32
    %72 = vector.broadcast %cst_31 : f32 to vector<32x128xf32>
    %73 = arith.maximumf %71, %72 : vector<32x128xf32>
    %74 = vector.shape_cast %73 : vector<32x128xf32> to vector<2x16x128xf32>
    %c0_32 = arith.constant 0 : index
    %c0_33 = arith.constant 0 : index
    %c0_34 = arith.constant 0 : index
    %75 = vector.load %arg8[%c0_32, %c0_33, %c0_34] : memref<2x16x128xf32, #tpu.memory_space<vmem>>, vector<2x16x128xf32>
    tpu.vector_store %arg8[%c0_32, %c0_33, %c0_34], %74 {strides = array<i32>} : memref<2x16x128xf32, #tpu.memory_space<vmem>>, vector<2x16x128xf32>,
    return
  }
  func.func @transform_0(%arg0: i32) -> (i32, i32, i32) {
    %c0_i32 = arith.constant 0 : i32
    %c0_i32_0 = arith.constant 0 : i32
    %c0_i32_1 = arith.constant 0 : i32
    return %arg0, %c0_i32, %c0_i32_0 : i32, i32, i32
  }
  func.func @transform_1(%arg0: i32) -> (i32, i32) {
    %c0_i32 = arith.constant 0 : i32
    %c0_i32_0 = arith.constant 0 : i32
    %c0_i32_1 = arith.constant 0 : i32
    return %c0_i32, %c0_i32_0 : i32, i32
  }
  func.func @transform_2(%arg0: i32) -> (i32, i32) {
    %c0_i32 = arith.constant 0 : i32
    %c0_i32_0 = arith.constant 0 : i32
    %c0_i32_1 = arith.constant 0 : i32
    return %c0_i32, %c0_i32_0 : i32, i32
  }
  func.func @transform_3(%arg0: i32) -> (i32, i32) {
    %c0_i32 = arith.constant 0 : i32
    %c0_i32_0 = arith.constant 0 : i32
    %c0_i32_1 = arith.constant 0 : i32
    return %c0_i32, %c0_i32_0 : i32, i32
  }
  func.func @transform_4(%arg0: i32) -> (i32, i32) {
    %c0_i32 = arith.constant 0 : i32
    %c0_i32_0 = arith.constant 0 : i32
    %c0_i32_1 = arith.constant 0 : i32
    return %c0_i32, %c0_i32_0 : i32, i32
  }
  func.func @transform_5(%arg0: i32) -> (i32, i32) {
    %c0_i32 = arith.constant 0 : i32
    %c0_i32_0 = arith.constant 0 : i32
    %c0_i32_1 = arith.constant 0 : i32
    return %c0_i32, %c0_i32_0 : i32, i32
  }
  func.func @transform_6(%arg0: i32) -> (i32, i32) {
    %c0_i32 = arith.constant 0 : i32
    %c0_i32_0 = arith.constant 0 : i32
    %c0_i32_1 = arith.constant 0 : i32
    return %c0_i32, %c0_i32_0 : i32, i32
  }
  func.func @transform_7(%arg0: i32) -> (i32, i32, i32) {
    %c0_i32 = arith.constant 0 : i32
    %c0_i32_0 = arith.constant 0 : i32
    %c0_i32_1 = arith.constant 0 : i32
    return %arg0, %c0_i32, %c0_i32_0 : i32, i32, i32
  }
}

</mosaic_0001>

<bundles_post_ra>
// kernel: tpu_custom_call.1
= control target key start
LH: loop header
LB: loop body
LE: loop exit
PB: predicated region body
PF: predicated region fallthrough
CT: control target
= control target key end

     0   :  { %12 = vsyncpa [#allocation3], 0  ;;  %s1300_s0 = inlined_call_operand.hbm [shape: f32[2,16,128], index: 0, kind: input, shape index: {}]   ;;  %s1301_s1 = inlined_call_operand.hbm [shape: bf16[128,128], index: 1, kind: input, shape index: {}]   ;;  %s1302_s2 = inlined_call_operand.vmem [shape: f32[1,128], index: 2, kind: input, shape index: {}]   ;;  %s1303_s3 = inlined_call_operand.hbm [shape: bf16[384,128], index: 3, kind: input, shape index: {}]   ;;  %s1304_s4 = inlined_call_operand.vmem [shape: f32[1,128], index: 4, kind: input, shape index: {}]   ;;  %s1305_s5 = inlined_call_operand.hbm [shape: bf16[128,128], index: 5, kind: input, shape index: {}]   ;;  %s1306_s6 = inlined_call_operand.vmem [shape: f32[1,128], index: 6, kind: input, shape index: {}]   ;;  %s1307_s7 = inlined_call_operand.hbm [shape: f32[2,16,128], index: 7, kind: output, shape index: {}]  }
   0x1   :  { %13 = vsyncpa [#allocation6], 0 }
   0x2   :  { %14 = vsyncpa [#allocation9], 0 }
   0x3   :  { %15 = vsyncpa [#allocation4], 0  ;;  %s1113_s24 = smov [#allocation5]   ;;  %s995_s28 = scalar_lea.hbm %s1301_s1, 1024 }
   0x4   :  { %s33_s25 = sshll.u32 %s1113_s24, 4  ;;  %p996_p0 = scmp.ne.s32.totalorder %s1301_s1, %s995_s28  ;;  %s34_s25 = int_to_ptr.vmem [resolvable:$true] %s33_s25 }
   0x5   :  { %p999_p1 = scmp.lt.u32.totalorder %s995_s28, %s1301_s1 }
   0x7   :  { %p1001_p2 = pnand %p999_p1, %p996_p0 }
   0x9   :  { %1004 = shalt.err (!%p1001_p2)
}
   0xa   :  { %s1005_s10 = scalar_lea.vmem %s34_s25, 1024  ;;  %p1010_p4 = scmp.lt.s32.totalorder %s34_s25, %s34_s25 }
   0xb   :  { %p1006_p3 = scmp.ne.s32.totalorder %s34_s25, %s1005_s10  ;;  %p1011_p5 = scmp.lt.s32.totalorder %s1005_s10, %s1005_s10 }
   0xd   :  { %p1012_p6 = por %p1011_p5, %p1010_p4 }
   0xf   :  { %p1013_p7 = pnand %p1012_p6, %p1006_p3 }
  0x11   :  { %1016 = shalt.err (!%p1013_p7)
}
  0x12   :  { %s1114_s11 = smov 64   ;;  %s1115_s12 = smov 4  }
  0x13   :  { %39 = dma.hbm_to_vmem [thread:$0]  %s1301_s1, 1024, %s34_s25, [#allocation6], %s1114_s11, %s1114_s11, %s1115_s12  }
  0x14   :  { %s1116_s15 = smov [#allocation2]   ;;  %s1017_s19 = scalar_lea.hbm %s1300_s0, 512 }
  0x15   :  { %s21_s16 = sshll.u32 %s1116_s15, 4  ;;  %p1018_p8 = scmp.ne.s32.totalorder %s1300_s0, %s1017_s19  ;;  %s22_s16 = int_to_ptr.vmem [resolvable:$true] %s21_s16 }
  0x16   :  { %p1021_p9 = scmp.lt.u32.totalorder %s1017_s19, %s1300_s0 }
  0x18   :  { %p1023_p10 = pnand %p1021_p9, %p1018_p8 }
  0x1a   :  { %1026 = shalt.err (!%p1023_p10)
}
  0x1b   :  { %s1027_s24 = scalar_lea.vmem %s22_s16, 512  ;;  %p1032_p12 = scmp.lt.s32.totalorder %s22_s16, %s22_s16 }
  0x1c   :  { %p1028_p11 = scmp.ne.s32.totalorder %s22_s16, %s1027_s24  ;;  %p1033_p13 = scmp.lt.s32.totalorder %s1027_s24, %s1027_s24 }
  0x1e   :  { %p1034_p0 = por %p1033_p13, %p1032_p12 }
  0x20   :  { %p1035_p1 = pnand %p1034_p0, %p1028_p11 }
  0x22   :  { %1038 = shalt.err (!%p1035_p1)
}
  0x23   :  { %s1117_s1 = smov 128   ;;  %s1118_s25 = smov 8  }
  0x24   :  { %27 = dma.hbm_to_vmem [thread:$0]  %s1300_s0, 512, %s22_s16, [#allocation3], %s1117_s1, %s1117_s1, %s1118_s25  }
  0x25   :  { %s1119_s28 = smov [#allocation7]   ;;  %s1120_s30 = smov [#allocation8]  }
  0x26   :  { %s47_s29 = sshll.u32 %s1119_s28, 4  ;;  %s61_s8 = sshll.u32 %s1120_s30, 4  ;;  %s48_s29 = int_to_ptr.vmem [resolvable:$true] %s47_s29  ;;  %s1193_s8 = int_to_ptr.vmem [resolvable:$true] %s61_s8 }
  0x27   :  { %s1039_s13 = scalar_lea.hbm %s1303_s3, 3072 }
  0x28   :  { %p1040_p2 = scmp.ne.s32.totalorder %s1303_s3, %s1039_s13  ;;  %p1043_p3 = scmp.lt.u32.totalorder %s1039_s13, %s1303_s3 }
  0x2a   :  { %p1045_p4 = pnand %p1043_p3, %p1040_p2 }
  0x2c   :  { %1048 = shalt.err (!%p1045_p4)
}
  0x2d   :  { %s1049_s0 = scalar_lea.vmem %s48_s29, 3072  ;;  %p1054_p6 = scmp.lt.s32.totalorder %s48_s29, %s48_s29 }
  0x2e   :  { %p1050_p5 = scmp.ne.s32.totalorder %s48_s29, %s1049_s0  ;;  %p1055_p7 = scmp.lt.s32.totalorder %s1049_s0, %s1049_s0 }
  0x30   :  { %p1056_p8 = por %p1055_p7, %p1054_p6 }
  0x32   :  { %p1057_p9 = pnand %p1056_p8, %p1050_p5 }
  0x34   :  { %1060 = shalt.err (!%p1057_p9)
}
  0x35   :  { %53 = dma.hbm_to_vmem [thread:$0]  %s1303_s3, 3072, %s48_s29, [#allocation6], %s1114_s11, %s1114_s11, %s1115_s12  }
  0x36   :  { %s1061_s22 = scalar_lea.hbm %s1305_s5, 1024 }
  0x37   :  { %p1062_p10 = scmp.ne.s32.totalorder %s1305_s5, %s1061_s22  ;;  %p1065_p11 = scmp.lt.u32.totalorder %s1061_s22, %s1305_s5 }
  0x39   :  { %p1067_p12 = pnand %p1065_p11, %p1062_p10 }
  0x3b   :  { %1070 = shalt.err (!%p1067_p12)
}
  0x3c   :  { %s1071_s28 = scalar_lea.vmem %s1193_s8, 1024  ;;  %p1076_p0 = scmp.lt.s32.totalorder %s1193_s8, %s1193_s8 }
  0x3d   :  { %p1072_p13 = scmp.ne.s32.totalorder %s1193_s8, %s1071_s28  ;;  %p1077_p1 = scmp.lt.s32.totalorder %s1071_s28, %s1071_s28 }
  0x3f   :  { %p1078_p2 = por %p1077_p1, %p1076_p0 }
  0x41   :  { %p1079_p3 = pnand %p1078_p2, %p1072_p13 }
  0x43   :  { %1082 = shalt.err (!%p1079_p3)
}
  0x44   :  { %67 = dma.hbm_to_vmem [thread:$0]  %s1305_s5, 1024, %s1193_s8, [#allocation9], %s1114_s11, %s1114_s11, %s1115_s12  }
  0x45   :  { %1105 = dma.done.wait [#allocation3], 512  }
  0x46   :  { %1106 = vsyncadd [#allocation3], 4294966784 }
  0x47   :  { %1107 = dma.done.wait [#allocation6], 4096  }
  0x48   :  { %1108 = vsyncadd [#allocation6], 4294963200 }
  0x49   :  { %1109 = dma.done.wait [#allocation9], 1024  }
  0x4a   :  { %1110 = vsyncadd [#allocation9], 4294966272  ;;  %v955_v0 = vld [vmem:[#allocation5] sm:$0xff]   ;;  %v956_v1 = vld [vmem:[#allocation5 + $0x8] sm:$0xff]   ;;  %v243_v39 = vlaneseq  ;;  %vm217_vm0 = vcmask 1040384   ;;  %vm230_vm1 = vcmask 1046528  }
  0x4b   :  { %885 = vmatprep.subr.bf16.mxu0 %v955_v0  ;;  %v957_v2 = vld [vmem:[#allocation5 + $0x10] sm:$0xff]   ;;  %v958_v3 = vld [vmem:[#allocation5 + $0x18] sm:$0xff]   ;;  %v1230_v4 = vld [vmem:[#allocation2] sm:$0xff]  ;;  %vm1121_vm5 = vmmov 1   ;;  %s1122_s8 = smov [#allocation10]  }
  0x4c   :  { %886 = vmatpush3.bf16.msra.mxu0 %v955_v0  ;;  %v1232_v5 = vld [vmem:[#allocation2 + $0x8] sm:$0xff]  ;;  %v963_v7 = vld [vmem:[#allocation7 + $0x40] sm:$0xff]   ;;  %v969_v13 = vld [vmem:[#allocation7 + $0x50] sm:$0xff]   ;;  %v244_v40 = vshrl.u32 %v243_v39, 7  ;;  %s758_s9 = sshll.u32 %s1122_s8, 4  ;;  %s759_s9 = int_to_ptr.vmem [resolvable:$true] %s758_s9 }
  0x4d   :  { %887 = vmatprep.subr.bf16.mxu0 %v956_v1  ;;  %v87_v6 = vpack.c.bf16 %v1232_v5, %v1230_v4  ;;  %v964_v8 = vld [vmem:[#allocation7] sm:$0xff]   ;;  %837 = vmatprep.subr.bf16.mxu1 %v963_v7  ;;  %v966_v10 = vld [vmem:[#allocation7 + $0x48] sm:$0xff]   ;;  %v970_v14 = vld [vmem:[#allocation7 + $0x10] sm:$0xff]   ;;  %p1088_p5 = scmp.lt.s32.totalorder %s759_s9, %s759_s9 }
  0x4e   :  { %v959_v9 = vld [vmem:[#allocation5 + $0x20] sm:$0xff]   ;;  %838 = vmatpush3.bf16.msra.mxu1 %v964_v8  ;;  %v967_v11 = vld [vmem:[#allocation7 + $0x8] sm:$0xff]   ;;  %v972_v15 = vld [vmem:[#allocation7 + $0x58] sm:$0xff]   ;;  %v245_v41 = vadd.s32 8, %v244_v40  ;;  %v247_v42 = vadd.s32 24, %v244_v40  ;;  %v252_v47 = vand.u32 15, %v244_v40 }
  0x4f   :  { %901 = vmatprep.mubr.bf16.mxu0 %v87_v6  ;;  %v960_v12 = vld [vmem:[#allocation5 + $0x28] sm:$0xff]   ;;  %839 = vmatprep.subr.bf16.mxu1 %v966_v10  ;;  %v961_v16 = vld [vmem:[#allocation5 + $0x30] sm:$0xff]   ;;  %v973_v17 = vld [vmem:[#allocation7 + $0x18] sm:$0xff]   ;;  %v246_v0 = vadd.s32 16, %v244_v40 }
  0x50   :  { %888 = vmatpush3.bf16.msra.mxu0 %v956_v1  ;;  %v975_v18 = vld [vmem:[#allocation7 + $0x60] sm:$0xff]   ;;  %v962_v19 = vld [vmem:[#allocation5 + $0x38] sm:$0xff]   ;;  %v1236_v21 = vld [vmem:[#allocation2 + $0x10] sm:$0xff]  ;;  %v259_v48 = vand.u32 15, %v245_v41  ;;  %v273_v49 = vand.u32 15, %v247_v42  ;;  %vm1245_vm2 = vcmp.ne.s32.totalorder %v252_v47, 0 }
  0x51   :  { %889 = vmatprep.subr.bf16.mxu0 %v957_v2  ;;  %v976_v20 = vld [vmem:[#allocation7 + $0x20] sm:$0xff]   ;;  %v1238_v22 = vld [vmem:[#allocation2 + $0x18] sm:$0xff]  ;;  %v968_v25 = vld [vmem:[#allocation7 + $0x88] sm:$0xff]  }
  0x52   :  { %840 = vmatpush3.bf16.msra.mxu1 %v967_v11  ;;  %v965_v23 = vld [vmem:[#allocation7 + $0x80] sm:$0xff]   ;;  %v88_v24 = vpack.c.bf16 %v1238_v22, %v1236_v21  ;;  %v971_v26 = vld [vmem:[#allocation7 + $0x90] sm:$0xff]   ;;  %v974_v27 = vld [vmem:[#allocation7 + $0x98] sm:$0xff]   ;;  %vm1249_vm3 = vcmp.ne.s32.totalorder %v259_v48, 15  ;;  %vm1253_vm4 = vcmp.ne.s32.totalorder %v273_v49, 15 }
  0x53   :  { %841 = vmatprep.subr.bf16.mxu1 %v969_v13  ;;  %v977_v28 = vld [vmem:[#allocation7 + $0xa0] sm:$0xff]   ;;  %v978_v29 = vld [vmem:[#allocation7 + $0x68] sm:$0xff]   ;;  %v981_v32 = vld [vmem:[#allocation7 + $0x70] sm:$0xff]  }
  0x54   :  { %890 = vmatpush3.bf16.msra.mxu0 %v957_v2  ;;  %v979_v30 = vld [vmem:[#allocation7 + $0x28] sm:$0xff]   ;;  %v982_v33 = vld [vmem:[#allocation7 + $0x30] sm:$0xff]   ;;  %v984_v35 = vld [vmem:[#allocation7 + $0x78] sm:$0xff]  }
  0x55   :  { %891 = vmatprep.subr.bf16.mxu0 %v958_v3  ;;  %v980_v31 = vld [vmem:[#allocation7 + $0xa8] sm:$0xff]   ;;  %v983_v34 = vld [vmem:[#allocation7 + $0xb0] sm:$0xff]   ;;  %v985_v36 = vld [vmem:[#allocation7 + $0x38] sm:$0xff]  }
  0x56   :  { %842 = vmatpush3.bf16.msra.mxu1 %v970_v14  ;;  %v986_v37 = vld [vmem:[#allocation7 + $0xb8] sm:$0xff]   ;;  %v987_v38 = vld [vmem:[#allocation8] sm:$0xff]   ;;  %vm806_vm6 = vmpackc.low %vm1121_vm5, %vm1245_vm2 }
  0x57   :  { %843 = vmatprep.subr.bf16.mxu1 %v972_v15  ;;  %v772_v43 = vld [vmem:[%s1302_s2] ss:$0 sm:$0xff]  ;;  %vm812_vm7 = vmpackc.low %vm1249_vm3, %vm1121_vm5 }
  0x58   :  { %892 = vmatpush3.bf16.msra.mxu0 %v958_v3  ;;  %vm815_vm8 = vmpackc.low %vm1253_vm4, %vm1121_vm5 }
  0x59   :  { %893 = vmatprep.subr.bf16.mxu0 %v959_v9 }
  0x5a   :  { %844 = vmatpush3.bf16.msra.mxu1 %v973_v17 }
  0x5b   :  { %845 = vmatprep.subr.bf16.mxu1 %v975_v18 }
  0x5c   :  { %894 = vmatpush3.bf16.msra.mxu0 %v959_v9 }
  0x5d   :  { %895 = vmatprep.subr.bf16.mxu0 %v960_v12 }
  0x5e   :  { %846 = vmatpush3.bf16.msra.mxu1 %v976_v20 }
  0x5f   :  { %847 = vmatprep.subr.bf16.mxu1 %v978_v29  ;;  %v991_v29 = vld [vmem:[#allocation8 + $0x20] sm:$0xff]  }
  0x60   :  { %896 = vmatpush3.bf16.msra.mxu0 %v960_v12 }
  0x61   :  { %897 = vmatprep.subr.bf16.mxu0 %v961_v16 }
  0x62   :  { %848 = vmatpush3.bf16.msra.mxu1 %v979_v30  ;;  %v992_v30 = vld [vmem:[#allocation8 + $0x28] sm:$0xff]  }
  0x63   :  { %849 = vmatprep.subr.bf16.mxu1 %v981_v32  ;;  %v994_v32 = vld [vmem:[#allocation8 + $0x38] sm:$0xff]  }
  0x64   :  { %898 = vmatpush3.bf16.msra.mxu0 %v961_v16 }
  0x65   :  { %899 = vmatprep.subr.bf16.mxu0 %v962_v19 }
  0x66   :  { %850 = vmatpush3.bf16.msra.mxu1 %v982_v33 }
  0x67   :  { %851 = vmatprep.subr.bf16.mxu1 %v984_v35 }
  0x68   :  { %900 = vmatpush3.bf16.msra.mxu0 %v962_v19 }
  0x69   :  { %905 = vmatprep.subr.bf16.mxu0 %v965_v23 }
  0x6a   :  { %852 = vmatpush3.bf16.msra.mxu1 %v985_v36  ;;  %v781_v36 = vld [vmem:[%s1304_s4] ss:$0 sm:$0xff] }
  0x6b   :  { %902 = vmatmul.mubr.bf16.vlgmr.msra.gmra.mrb[0].mxu0 %v88_v24  ;;  %925 = vmatprep.subr.bf16.mxu1 %v987_v38  ;;  %v266_v24 = vand.u32 15, %v246_v0  ;;  %v818_v0 = vld [vmem:[%s1306_s6] ss:$0 sm:$0xff]  ;;  %s1083_s6 = scalar_lea.vmem %s759_s9, 512 }
  0x6c   :  { %906 = vmatpush3.bf16.msra.mxu0 %v965_v23  ;;  %p1084_p4 = scmp.ne.s32.totalorder %s759_s9, %s1083_s6  ;;  %p1089_p6 = scmp.lt.s32.totalorder %s1083_s6, %s1083_s6 }
  0x6d   :  { %907 = vmatprep.subr.bf16.mxu0 %v968_v25  ;;  %vm298_vm9 = vcmp.ne.s32.totalorder %v266_v24, 0 }
  0x6e   :  { %vm809_vm10 = vmpackc.low %vm1121_vm5, %vm298_vm9  ;;  %p1090_p7 = por %p1089_p6, %p1088_p5 }
  0x70   :  { %908 = vmatpush3.bf16.msra.mxu0 %v968_v25  ;;  %p1091_p8 = pnand %p1090_p7, %p1084_p4 }
  0x71   :  { %909 = vmatprep.subr.bf16.mxu0 %v971_v26 }
  0x74   :  { %910 = vmatpush3.bf16.msra.mxu0 %v971_v26  ;;  %v988_v26 = vld [vmem:[#allocation8 + $0x8] sm:$0xff]  }
  0x75   :  { %911 = vmatprep.subr.bf16.mxu0 %v974_v27 }
  0x78   :  { %912 = vmatpush3.bf16.msra.mxu0 %v974_v27  ;;  %v989_v27 = vld [vmem:[#allocation8 + $0x10] sm:$0xff]  }
  0x79   :  { %913 = vmatprep.subr.bf16.mxu0 %v977_v28 }
  0x7c   :  { %914 = vmatpush3.bf16.msra.mxu0 %v977_v28  ;;  %v990_v28 = vld [vmem:[#allocation8 + $0x18] sm:$0xff]  }
  0x7d   :  { %915 = vmatprep.subr.bf16.mxu0 %v980_v31 }
  0x80   :  { %916 = vmatpush3.bf16.msra.mxu0 %v980_v31  ;;  %v993_v31 = vld [vmem:[#allocation8 + $0x30] sm:$0xff]  }
  0x81   :  { %917 = vmatprep.subr.bf16.mxu0 %v983_v34 }
  0x84   :  { %918 = vmatpush3.bf16.msra.mxu0 %v983_v34 }
  0x85   :  { %919 = vmatprep.subr.bf16.mxu0 %v986_v37 }
  0x88   :  { %920 = vmatpush3.bf16.msra.mxu0 %v986_v37 }
 0x13e   :  { %v903_v44 = vpop.f32.mrb[0].mxu0 }
 0x13f   :  { %v203_v45 = vadd.f32 %v903_v44, %v772_v43  ;;  %v194_v46 = vpop.f32.mrb[1].mxu0 }
 0x140   :  { %v195_v50 = vadd.f32 %v772_v43, %v194_v46  ;;  %v904_v51 = vpop.f32.mrb[2].mxu0 }
 0x141   :  { %v211_v52 = vmax.f32 %v203_v45, 0.0  ;;  %v206_v53 = vadd.f32 %v904_v51, %v772_v43  ;;  %v197_v54 = vpop.f32.mrb[3].mxu0 }
 0x142   :  { %v209_v55 = vmax.f32 %v195_v50, 0.0  ;;  %v198_v56 = vadd.f32 %v772_v43, %v197_v54 }
 0x143   :  { %v212_v57 = vmax.f32 %v206_v53, 0.0  ;;  %v221_v61 = vrot.slane %v211_v52, 7  ;;  %v234_v1 = vrot.slane %v211_v52, 1 }
 0x144   :  { %v218_v62 = vrot.slane %v209_v55, 7  ;;  %v210_v63 = vmax.f32 %v198_v56, 0.0  ;;  %v231_v7 = vrot.slane %v209_v55, 1 }
 0x145   :  { %v223_v2 = vrot.slane %v212_v57, 7  ;;  %v236_v3 = vrot.slane %v212_v57, 1  ;;  %v316_v6 = vpack.c.bf16 %v212_v57, %v211_v52 }
 0x146   :  { %v219_v8 = vrot.slane %v210_v63, 7  ;;  %v232_v9 = vrot.slane %v210_v63, 1  ;;  %v313_v10 = vpack.c.bf16 %v210_v63, %v209_v55  ;;  %v229_v11 = vsel %vm217_vm0, 0.0, %v218_v62 }
 0x147   :  { %v237_v12 = vsel %vm230_vm1, %v234_v1, %v236_v3  ;;  %v242_v13 = vsel %vm230_vm1, %v236_v3, 0.0  ;;  %v224_v14 = vsel %vm217_vm0, %v221_v61, %v223_v2 }
 0x148   :  { %v816_v15 = vpack.c.bf16 %v242_v13, %v237_v12  ;;  %549 = vmatprep.mubr.bf16.mxu1 %v313_v10  ;;  %v220_v16 = vsel %vm217_vm0, %v218_v62, %v219_v8  ;;  %v233_v17 = vsel %vm230_vm1, %v231_v7, %v232_v9  ;;  %v235_v18 = vsel %vm230_vm1, %v232_v9, %v234_v1 }
 0x149   :  { %v807_v19 = vpack.c.bf16 %v220_v16, %v229_v11  ;;  %v813_v20 = vpack.c.bf16 %v235_v18, %v233_v17  ;;  %v222_v23 = vsel %vm217_vm0, %v219_v8, %v221_v61 }
 0x14a   :  { %v810_v25 = vpack.c.bf16 %v224_v14, %v222_v23 }
 0x14b   :  { %808 = vmatmul.mubr.msk.bf16.vlgmr.msra.gmra.mrb[0].mxu1 %vm806_vm6, %v807_v19  ;;  %921 = vmatprep.mubr.msk.bf16.mxu0 %vm812_vm7, %v813_v20 }
 0x14c   :  { %557 = vmatprep.mubr.bf16.mxu1 %v316_v6  ;;  %922 = vmatmul.mubr.msk.bf16.vlgmr.msra.gmra.mrb[4].mxu0 %vm815_vm8, %v816_v15 }
 0x14d   :  { %926 = vmatpush3.bf16.msra.mxu1 %v987_v38 }
 0x14e   :  { %927 = vmatprep.subr.bf16.mxu1 %v988_v26 }
 0x151   :  { %928 = vmatpush3.bf16.msra.mxu1 %v988_v26 }
 0x152   :  { %929 = vmatprep.subr.bf16.mxu1 %v989_v27 }
 0x153   :  { %811 = vmatmul.mubr.msk.bf16.gmra.mrb[4].mxu1 %vm809_vm10, %v810_v25 }
 0x155   :  { %930 = vmatpush3.bf16.msra.mxu1 %v989_v27 }
 0x156   :  { %931 = vmatprep.subr.bf16.mxu1 %v990_v28 }
 0x159   :  { %932 = vmatpush3.bf16.msra.mxu1 %v990_v28 }
 0x15a   :  { %933 = vmatprep.subr.bf16.mxu1 %v991_v29 }
 0x15d   :  { %934 = vmatpush3.bf16.msra.mxu1 %v991_v29 }
 0x15e   :  { %935 = vmatprep.subr.bf16.mxu1 %v992_v30 }
 0x161   :  { %936 = vmatpush3.bf16.msra.mxu1 %v992_v30 }
 0x162   :  { %937 = vmatprep.subr.bf16.mxu1 %v993_v31 }
 0x165   :  { %938 = vmatpush3.bf16.msra.mxu1 %v993_v31 }
 0x166   :  { %939 = vmatprep.subr.bf16.mxu1 %v994_v32 }
 0x169   :  { %940 = vmatpush3.bf16.msra.mxu1 %v994_v32 }
 0x21e   :  { %v853_v33 = vpop.f32.mrb[0].mxu1 }
 0x21f   :  { %v854_v34 = vpop.f32.mrb[1].mxu1  ;;  %v923_v35 = vpop.f32.mrb[4].mxu0 }
 0x220   :  { %v855_v37 = vadd.f32 %v854_v34, %v853_v33  ;;  %v856_v38 = vpop.f32.mrb[2].mxu1  ;;  %v600_v39 = vpop.f32.mrb[5].mxu0 }
 0x221   :  { %v857_v40 = vpop.f32.mrb[3].mxu1  ;;  %v924_v41 = vpop.f32.mrb[6].mxu0 }
 0x222   :  { %v552_v42 = vadd.f32 %v855_v37, %v781_v36  ;;  %v858_v43 = vadd.f32 %v857_v40, %v856_v38  ;;  %v603_v44 = vpop.f32.mrb[7].mxu0 }
 0x224   :  { %v601_v45 = vadd.f32 %v600_v39, %v552_v42  ;;  %v555_v46 = vadd.f32 %v858_v43, %v781_v36 }
 0x226   :  { %v604_v47 = vadd.f32 %v603_v44, %v555_v46  ;;  %v859_v48 = vpop.f32.mrb[4].mxu1  ;;  %v615_v50 = vmax.f32 %v601_v45, 0.0 }
 0x227   :  { %v860_v49 = vpop.f32.mrb[5].mxu1 }
 0x228   :  { %v616_v51 = vmax.f32 %v604_v47, 0.0  ;;  %v861_v52 = vadd.f32 %v860_v49, %v859_v48  ;;  %v862_v53 = vpop.f32.mrb[6].mxu1 }
 0x229   :  { %v863_v54 = vpop.f32.mrb[7].mxu1 }
 0x22a   :  { %v619_v55 = vpack.c.bf16 %v616_v51, %v615_v50  ;;  %v560_v56 = vadd.f32 %v861_v52, %v781_v36  ;;  %v864_v57 = vadd.f32 %v863_v54, %v862_v53 }
 0x22c   :  { %v609_v58 = vadd.f32 %v923_v35, %v560_v56  ;;  %v563_v59 = vadd.f32 %v864_v57, %v781_v36  ;;  %941 = vmatprep.mubr.bf16.mxu1 %v619_v55 }
 0x22e   :  { %v612_v60 = vadd.f32 %v924_v41, %v563_v59  ;;  %v617_v61 = vmax.f32 %v609_v58, 0.0 }
 0x230   :  { %v618_v62 = vmax.f32 %v612_v60, 0.0 }
 0x232   :  { %v620_v63 = vpack.c.bf16 %v618_v62, %v617_v61 }
 0x234   :  { %942 = vmatmul.mubr.bf16.vlgmr.msra.gmra.mrb[8].mxu1 %v620_v63 }
 0x307   :  { %v943_v1 = vpop.f32.mrb[8].mxu1 }
 0x308   :  { %v735_v2 = vadd.f32 %v943_v1, %v818_v0  ;;  %v726_v3 = vpop.f32.mrb[9].mxu1 }
 0x309   :  { %v727_v6 = vadd.f32 %v818_v0, %v726_v3  ;;  %v944_v7 = vpop.f32.mrb[10].mxu1 }
 0x30a   :  { %v743_v8 = vadd.f32 %v735_v2, %v1236_v21  ;;  %v738_v9 = vadd.f32 %v944_v7, %v818_v0  ;;  %v729_v10 = vpop.f32.mrb[11].mxu1 }
 0x30b   :  { %v741_v11 = vadd.f32 %v727_v6, %v1230_v4  ;;  %v730_v12 = vadd.f32 %v818_v0, %v729_v10 }
 0x30c   :  { %v747_v13 = vmax.f32 %v743_v8, 0.0  ;;  %v744_v14 = vadd.f32 %v738_v9, %v1238_v22 }
 0x30d   :  { %v745_v15 = vmax.f32 %v741_v11, 0.0  ;;  %v742_v16 = vadd.f32 %v730_v12, %v1232_v5 }
 0x30e   :  { %751 = vst [vmem:[#allocation10 + $0x10] sm:$0xff] %v747_v13  ;;  %v748_v17 = vmax.f32 %v744_v14, 0.0 }
 0x30f   :  { %749 = vst [vmem:[#allocation10] sm:$0xff] %v745_v15  ;;  %v746_v18 = vmax.f32 %v742_v16, 0.0 }
 0x310   :  { %752 = vst [vmem:[#allocation10 + $0x18] sm:$0xff] %v748_v17 }
 0x311   :  { %750 = vst [vmem:[#allocation10 + $0x8] sm:$0xff] %v746_v18 }
 0x312   :  { %1094 = shalt.err (!%p1091_p8)
}
 0x313   :  { %s1095_s14 = scalar_lea.hbm %s1307_s7, 512 }
 0x314   :  { %p1096_p9 = scmp.ne.s32.totalorder %s1307_s7, %s1095_s14  ;;  %p1099_p10 = scmp.lt.u32.totalorder %s1095_s14, %s1307_s7 }
 0x316   :  { %p1101_p11 = pnand %p1099_p10, %p1096_p9 }
 0x318   :  { %1104 = shalt.err (!%p1101_p11)
}
 0x319   :  { %764 = dma.vmem_to_hbm [thread:$0]  %s759_s9, 512, %s1307_s7, [#allocation4], %s1117_s1, %s1117_s1, %s1118_s25  }
 0x31a   :  { %1111 = dma.done.wait [#allocation4], 512  }
 0x31b   :  { %1112 = vsyncadd [#allocation4], 4294966784 }
 0x31c   :  { %768 = vsyncpa [#allocation3], 1 }
 0x31d   :  { %769 = vsyncpa [#allocation6], 1 }
 0x31e   :  { %770 = vsyncpa [#allocation9], 1 }
 0x31f   :  { %771 = vsyncpa [#allocation4], 1 }

</bundles_post_ra>
